<compile_context>
chip_gen: v6e
topology: v6e:2x2x1
jax: 0.10.0
libtpu: 0.0.40
codegen_flags: <defaults>
</compile_context>

<pallas_src>
import functools

import numpy as np
import jax
import jax.numpy as jnp
from jax.experimental import pallas as pl
from jax.experimental.pallas import tpu as pltpu


def _round_up(x, m):
    return ((x + m - 1) // m) * m


def _next_pow2(x):
    return 1 << int(np.ceil(np.log2(max(int(x), 1))))


def _tree_attention_kernel(start_ref, ntiles_ref, q_ref, off_ref, len_ref, mem_ref,
                           out_ref, m_sc, l_sc, acc_sc, *, sub_n):
    """Grid = (batch blocks, node tiles within the block's segment range).

    start_ref / ntiles_ref are scalar-prefetched SMEM arrays (per batch block).
    The node axis is an online-softmax reduction into VMEM scratch.
    """
    b = pl.program_id(0)
    k = pl.program_id(1)
    tn = mem_ref.shape[0]
    n_sub = tn // sub_n

    @pl.when(k == 0)
    def _():
        m_sc[...] = jnp.full_like(m_sc, -jnp.inf)
        l_sc[...] = jnp.zeros_like(l_sc)
        acc_sc[...] = jnp.zeros_like(acc_sc)

    # Only node tiles that actually intersect this batch block's segments do work;
    # the clamped index_map re-presents the block's last tile for k >= ntiles, so
    # skipping here avoids double-counting and skips dead MXU/VPU work.
    @pl.when(k < ntiles_ref[b])
    def _():
        q = q_ref[...]                          # [Bt, M]  (already projected: dec @ W)
        off = off_ref[...]                      # [Bt, 1] int32  segment start
        end = off + len_ref[...]                # [Bt, 1] int32  segment end (exclusive)
        tile_base = (start_ref[b] + k) * tn     # global node index of this tile's row 0

        # Sub-chunk the node tile so [Bt, sub_n] f32 temporaries stay a few vregs
        # even with large node tiles (bounds vreg pressure / avoids VMEM spills).
        for c in range(n_sub):
            mem = mem_ref[pl.ds(c * sub_n, sub_n), :]                  # [sub, M]

            # scores[b, n] = <q_b, mem_n>  (contract over M, f32 accumulation on MXU)
            scores = jax.lax.dot_general(
                q, mem,
                dimension_numbers=(((1,), (1,)), ((), ())),
                preferred_element_type=jnp.float32)                    # [Bt, sub]

            gidx = (tile_base + c * sub_n
                    + jax.lax.broadcasted_iota(jnp.int32, scores.shape, 1))
            valid = (gidx >= off) & (gidx < end)                       # [Bt, sub]

            # Running max uses a -1e30 sentinel (not -inf) so exp(m - m_new) never
            # hits (-inf) - (-inf).  p must stay masked: for sub-chunks where an
            # instance has no valid nodes yet, exp(scores - m_new) would leak 1s.
            s = jnp.where(valid, scores, jnp.float32(-1e30))
            m_new = jnp.maximum(m_sc[...], jnp.max(s, axis=-1, keepdims=True))
            alpha = jnp.exp(m_sc[...] - m_new)
            p = jnp.where(valid, jnp.exp(scores - m_new), jnp.float32(0.0))

            l_sc[...] = alpha * l_sc[...] + jnp.sum(p, axis=-1, keepdims=True)
            acc_sc[...] = alpha * acc_sc[...] + jax.lax.dot_general(
                p.astype(mem.dtype), mem,
                dimension_numbers=(((1,), (0,)), ((), ())),
                preferred_element_type=jnp.float32)                    # [Bt, M]
            m_sc[...] = m_new

    @pl.when(k == pl.num_programs(1) - 1)
    def _():
        # Guard against zero-length (padded) instances: 0/0 -> 0, not NaN.
        denom = jnp.maximum(l_sc[...], jnp.float32(1e-30))
        out_ref[...] = (acc_sc[...] / denom).astype(out_ref.dtype)


def tree_attention(memory_bank, decoder_state, tree_node_num_lst, weight,
                   *, block_b=32, block_n=2048, sub_n=512, mem_dtype=jnp.bfloat16):
    """memory_bank: [total_nodes, M] f32; decoder_state: [B, H] f32;
    tree_node_num_lst: python list of ints (sum == total_nodes);
    weight: [H, M] f32 (PyTorch nn.Linear(memory_bank_size, hidden_size) layout).
    Returns context_feat: [B, M] f32."""
    lens = [int(n) for n in tree_node_num_lst]
    B, H = decoder_state.shape
    T, M = memory_bank.shape
    assert sum(lens) == T, "Memory bank is not consumed thoroughly"
    assert len(lens) == B

    # ---- factored projection: q = dec @ W  (one [B,H]x[H,M] matmul, outside the kernel)
    q = decoder_state.astype(jnp.float32) @ weight.astype(jnp.float32)   # [B, M]

    # ---- tiling (no pow-2 node bucketing; pad only to a multiple of the node tile)
    bt = min(block_b, _round_up(max(B, 1), 8))
    b_pad = _round_up(max(B, 1), bt)
    nb = b_pad // bt
    sub = max(128, min(sub_n, block_n))
    tn = min(_round_up(block_n, sub), _round_up(max(T, 1), sub))
    t_pad = _round_up(max(T, 1), tn)

    # ---- ragged bookkeeping: per-instance (offset, length) + per-block tile ranges
    starts = np.cumsum([0] + lens)
    off_np = np.zeros((b_pad, 1), np.int32)
    len_np = np.zeros((b_pad, 1), np.int32)
    off_np[:B, 0] = starts[:-1]
    len_np[:B, 0] = lens

    start_tile_np = np.zeros((nb,), np.int32)
    ntiles_np = np.zeros((nb,), np.int32)
    for blk in range(nb):
        i0, i1 = blk * bt, min((blk + 1) * bt, B)
        if i0 >= i1:
            continue
        rs, re = int(starts[i0]), int(starts[i1])
        st = rs // tn
        start_tile_np[blk] = st
        ntiles_np[blk] = max(-(-re // tn) - st, 1)
    grid_k = _next_pow2(int(ntiles_np.max()) if nb else 1)

    # ---- device data (cast + pad is one fused pass; zeros so masked dots never see NaN)
    mem_p = memory_bank.astype(mem_dtype)
    if t_pad > T:
        mem_p = jnp.pad(mem_p, ((0, t_pad - T), (0, 0)))
    q_p = jnp.pad(q, ((0, b_pad - B), (0, 0))).astype(mem_dtype)
    off_arr = jnp.asarray(off_np)
    len_arr = jnp.asarray(len_np)
    start_tiles = jnp.asarray(start_tile_np)
    ntiles = jnp.asarray(ntiles_np)

    # index_maps receive the scalar-prefetch refs as trailing positional args.
    def bmap(b, k, start_ref, ntiles_ref):
        return (b, 0)

    def mem_map(b, k, start_ref, ntiles_ref):
        last = jnp.maximum(ntiles_ref[b] - 1, 0)
        return (start_ref[b] + jnp.minimum(k, last), 0)

    out = pl.pallas_call(
        functools.partial(_tree_attention_kernel, sub_n=sub),
        out_shape=jax.ShapeDtypeStruct((b_pad, M), jnp.float32),
        grid_spec=pltpu.PrefetchScalarGridSpec(
            num_scalar_prefetch=2,
            grid=(nb, grid_k),
            in_specs=[
                pl.BlockSpec((bt, M), bmap),     # q (projected decoder state)
                pl.BlockSpec((bt, 1), bmap),     # segment offsets
                pl.BlockSpec((bt, 1), bmap),     # segment lengths
                pl.BlockSpec((tn, M), mem_map),  # memory bank node tile (data-dependent)
            ],
            out_specs=pl.BlockSpec((bt, M), bmap),
            scratch_shapes=[
                pltpu.VMEM((bt, 1), jnp.float32),   # running max
                pltpu.VMEM((bt, 1), jnp.float32),   # running denom
                pltpu.VMEM((bt, M), jnp.float32),   # context accumulator
            ],
        ),
        compiler_params=pltpu.CompilerParams(
            dimension_semantics=("parallel", "arbitrary")),
    )(start_tiles, ntiles, q_p, off_arr, len_arr, mem_p)

    return out[:B]


def tree_attention_ref(memory_bank, decoder_state, tree_node_num_lst, weight):
    """Pure-JAX reference mirroring the PyTorch loop exactly."""
    outs = []
    off = 0
    for i, n in enumerate(tree_node_num_lst):
        mem = memory_bank[off:off + n]                 # [n, M]
        off += n
        dec = decoder_state[i]                         # [H]
        enc = mem @ weight.T                           # [n, H]
        scores = enc @ dec                             # [n]
        scores = scores - jnp.max(scores)
        attn = jax.nn.softmax(scores)
        outs.append(attn @ mem)                        # [M]
    return jnp.stack(outs, axis=0)


if __name__ == "__main__":
    hidden_size = 32          # decoder hidden size H
    memory_bank_size = 64     # num_directions * encoder_size M

    key = jax.random.PRNGKey(0)
    k_mem, k_dec, k_w, k_mem2, k_dec2 = jax.random.split(key, 5)

    bound = 1.0 / np.sqrt(memory_bank_size)
    weight = jax.random.uniform(
        k_w, (hidden_size, memory_bank_size), jnp.float32, minval=-bound, maxval=bound)

    # --- test 1: tiny example matching the module docstring (f32 path, tight tolerance)
    tree_node_num_lst = [5, 9]
    batch_size = len(tree_node_num_lst)
    total_nodes = sum(tree_node_num_lst)
    memory_bank = jax.random.normal(k_mem, (total_nodes, memory_bank_size), jnp.float32)
    decoder_state = jax.random.normal(k_dec, (batch_size, hidden_size), jnp.float32)

    out = tree_attention(memory_bank, decoder_state, tree_node_num_lst, weight,
                         mem_dtype=jnp.float32)
    out = jax.block_until_ready(out)
    ref = tree_attention_ref(memory_bank, decoder_state, tree_node_num_lst, weight)
    assert out.shape == (batch_size, memory_bank_size)
    np.testing.assert_allclose(np.asarray(out), np.asarray(ref), rtol=1e-5, atol=1e-5)

    # --- test 2: ragged lengths spanning multiple node tiles / sub-chunks (exercises
    #             online softmax, data-dependent tiling, and the segment mask), f32 path
    tree_node_num_lst2 = [37, 123, 5, 260, 1, 94, 77]
    batch_size2 = len(tree_node_num_lst2)
    total_nodes2 = sum(tree_node_num_lst2)
    memory_bank2 = jax.random.normal(k_mem2, (total_nodes2, memory_bank_size), jnp.float32)
    decoder_state2 = jax.random.normal(k_dec2, (batch_size2, hidden_size), jnp.float32)

    out2 = tree_attention(memory_bank2, decoder_state2, tree_node_num_lst2, weight,
                          mem_dtype=jnp.float32, block_n=256, sub_n=128)
    out2 = jax.block_until_ready(out2)
    ref2 = tree_attention_ref(memory_bank2, decoder_state2, tree_node_num_lst2, weight)
    np.testing.assert_allclose(np.asarray(out2), np.asarray(ref2), rtol=1e-5, atol=1e-5)

    # --- test 3: default bf16 memory-bank path (halves HBM traffic; f32 softmax/accum)
    out3 = tree_attention(memory_bank2, decoder_state2, tree_node_num_lst2, weight)
    out3 = jax.block_until_ready(out3)
    np.testing.assert_allclose(np.asarray(out3), np.asarray(ref2), rtol=2e-2, atol=2e-2)

    print("KERNEL_OK")
</pallas_src>

<mosaic_0001>
module attributes {stable_mosaic.version = 11 : i64} {
  func.func @_tree_attention_kernel(%arg0: i32, %arg1: i32, %arg2: memref<1xi32, #tpu.memory_space<smem>>, %arg3: memref<1xi32, #tpu.memory_space<smem>>, %arg4: memref<8x64xf32, #tpu.memory_space<vmem>>, %arg5: memref<8x1xi32, #tpu.memory_space<vmem>>, %arg6: memref<8x1xi32, #tpu.memory_space<vmem>>, %arg7: memref<512x64xf32, #tpu.memory_space<vmem>>, %arg8: memref<8x64xf32, #tpu.memory_space<vmem>>, %arg9: memref<8x1xf32, #tpu.memory_space<vmem>>, %arg10: memref<8x1xf32, #tpu.memory_space<vmem>>, %arg11: memref<8x64xf32, #tpu.memory_space<vmem>>) attributes {dimension_semantics = [#tpu.dimension_semantics<parallel>, #tpu.dimension_semantics<arbitrary>], iteration_bounds = array<i64: 1, 1>, scalar_prefetch = 2 : i64, scratch_operands = 3 : i64, tpu.core_type = #tpu.core_type<tc>, window_params = [{transform_indices = @transform_0, window_bounds = array<i64: 8, 64>}, {transform_indices = @transform_1, window_bounds = array<i64: 8, 1>}, {transform_indices = @transform_2, window_bounds = array<i64: 8, 1>}, {transform_indices = @transform_3, window_bounds = array<i64: 512, 64>}, {transform_indices = @transform_4, window_bounds = array<i64: 8, 64>}]} {
    %c0_i32 = arith.constant 0 : i32
    %0 = arith.cmpi eq, %arg1, %c0_i32 : i32
    %1 = arith.extui %0 : i1 to i32
    %c0_i32_0 = arith.constant 0 : i32
    %2 = arith.cmpi ne, %1, %c0_i32_0 : i32
    scf.if %2 {
      %cst = arith.constant 0xFF800000 : f32
      %11 = vector.broadcast %cst : f32 to vector<8x1xf32>
      %c0 = arith.constant 0 : index
      %c0_4 = arith.constant 0 : index
      %12 = vector.load %arg9[%c0, %c0_4] : memref<8x1xf32, #tpu.memory_space<vmem>>, vector<8x1xf32>
      tpu.vector_store %arg9[%c0, %c0_4], %11 {strides = array<i32>} : memref<8x1xf32, #tpu.memory_space<vmem>>, vector<8x1xf32>,
      %cst_5 = arith.constant 0.000000e+00 : f32
      %13 = vector.broadcast %cst_5 : f32 to vector<8x1xf32>
      %c0_6 = arith.constant 0 : index
      %c0_7 = arith.constant 0 : index
      %14 = vector.load %arg10[%c0_6, %c0_7] : memref<8x1xf32, #tpu.memory_space<vmem>>, vector<8x1xf32>
      tpu.vector_store %arg10[%c0_6, %c0_7], %13 {strides = array<i32>} : memref<8x1xf32, #tpu.memory_space<vmem>>, vector<8x1xf32>,
      %cst_8 = arith.constant 0.000000e+00 : f32
      %15 = vector.broadcast %cst_8 : f32 to vector<8x64xf32>
      %c0_9 = arith.constant 0 : index
      %c0_10 = arith.constant 0 : index
      %16 = vector.load %arg11[%c0_9, %c0_10] : memref<8x64xf32, #tpu.memory_space<vmem>>, vector<8x64xf32>
      tpu.vector_store %arg11[%c0_9, %c0_10], %15 {strides = array<i32>} : memref<8x64xf32, #tpu.memory_space<vmem>>, vector<8x64xf32>,
    } else {
    }
    %3 = arith.index_cast %arg0 : i32 to index
    %4 = memref.load %arg3[%3] : memref<1xi32, #tpu.memory_space<smem>>
    %5 = arith.cmpi slt, %arg1, %4 : i32
    %6 = arith.extui %5 : i1 to i32
    %c0_i32_1 = arith.constant 0 : i32
    %7 = arith.cmpi ne, %6, %c0_i32_1 : i32
    scf.if %7 {
      %c0 = arith.constant 0 : index
      %c0_4 = arith.constant 0 : index
      %11 = vector.load %arg4[%c0, %c0_4] : memref<8x64xf32, #tpu.memory_space<vmem>>, vector<8x64xf32>
      %c0_5 = arith.constant 0 : index
      %c0_6 = arith.constant 0 : index
      %12 = vector.load %arg5[%c0_5, %c0_6] : memref<8x1xi32, #tpu.memory_space<vmem>>, vector<8x1xi32>
      %c0_7 = arith.constant 0 : index
      %c0_8 = arith.constant 0 : index
      %13 = vector.load %arg6[%c0_7, %c0_8] : memref<8x1xi32, #tpu.memory_space<vmem>>, vector<8x1xi32>
      %14 = arith.addi %12, %13 : vector<8x1xi32>
      %15 = arith.index_cast %arg0 : i32 to index
      %16 = memref.load %arg2[%15] : memref<1xi32, #tpu.memory_space<smem>>
      %17 = arith.addi %16, %arg1 : i32
      %c512_i32 = arith.constant 512 : i32
      %18 = arith.muli %17, %c512_i32 : i32
      %c0_9 = arith.constant 0 : index
      %c0_10 = arith.constant 0 : index
      %19 = vector.load %arg7[%c0_9, %c0_10] : memref<512x64xf32, #tpu.memory_space<vmem>>, vector<512x64xf32>
      %cst = arith.constant dense<0.000000e+00> : vector<8x512xf32>
      %20 = tpu.matmul %11, %19, %cst {dimension_numbers = #tpu.dot_dimension_numbers<[1], [1], [0], [0], [0, 0, 1, 0], [], []>} : vector<8x64xf32>, vector<512x64xf32>, vector<8x512xf32> -> vector<8x512xf32>
      %c0_i32_11 = arith.constant 0 : i32
      %21 = arith.addi %18, %c0_i32_11 : i32
      %22 = tpu.iota {dimensions = array<i32: 1>} : vector<8x512xi32>
      %23 = vector.broadcast %21 : i32 to vector<8x512xi32>
      %24 = arith.addi %23, %22 : vector<8x512xi32>
      %25 = vector.broadcast %12 : vector<8x1xi32> to vector<8x512xi32>
      %26 = arith.cmpi sge, %24, %25 : vector<8x512xi32>
      %27 = vector.broadcast %14 : vector<8x1xi32> to vector<8x512xi32>
      %28 = arith.cmpi slt, %24, %27 : vector<8x512xi32>
      %29 = arith.andi %26, %28 : vector<8x512xi1>
      %cst_12 = arith.constant -1.000000e+30 : f32
      %30 = vector.broadcast %cst_12 : f32 to vector<8x512xf32>
      %31 = arith.select %29, %20, %30 : vector<8x512xi1>, vector<8x512xf32>
      %c0_13 = arith.constant 0 : index
      %c0_14 = arith.constant 0 : index
      %32 = vector.load %arg9[%c0_13, %c0_14] : memref<8x1xf32, #tpu.memory_space<vmem>>, vector<8x1xf32>
      %cst_15 = arith.constant dense<0xFF800000> : vector<8xf32>
      %33 = vector.multi_reduction <maximumf>, %31, %cst_15 [1] : vector<8x512xf32> to vector<8xf32>
      %34 = vector.shape_cast %33 : vector<8xf32> to vector<8x1xf32>
      %35 = arith.maximumf %32, %34 : vector<8x1xf32>
      %c0_16 = arith.constant 0 : index
      %c0_17 = arith.constant 0 : index
      %36 = vector.load %arg9[%c0_16, %c0_17] : memref<8x1xf32, #tpu.memory_space<vmem>>, vector<8x1xf32>
      %37 = arith.subf %36, %35 : vector<8x1xf32>
      %38 = math.exp %37 : vector<8x1xf32>
      %39 = vector.broadcast %35 : vector<8x1xf32> to vector<8x512xf32>
      %40 = arith.subf %20, %39 : vector<8x512xf32>
      %41 = math.exp %40 : vector<8x512xf32>
      %cst_18 = arith.constant 0.000000e+00 : f32
      %42 = vector.broadcast %cst_18 : f32 to vector<8x512xf32>
      %43 = arith.select %29, %41, %42 : vector<8x512xi1>, vector<8x512xf32>
      %c0_19 = arith.constant 0 : index
      %c0_20 = arith.constant 0 : index
      %44 = vector.load %arg10[%c0_19, %c0_20] : memref<8x1xf32, #tpu.memory_space<vmem>>, vector<8x1xf32>
      %45 = arith.mulf %38, %44 : vector<8x1xf32>
      %cst_21 = arith.constant dense<0.000000e+00> : vector<8xf32>
      %46 = vector.multi_reduction <add>, %43, %cst_21 [1] : vector<8x512xf32> to vector<8xf32>
      %47 = vector.shape_cast %46 : vector<8xf32> to vector<8x1xf32>
      %48 = arith.addf %45, %47 : vector<8x1xf32>
      %c0_22 = arith.constant 0 : index
      %c0_23 = arith.constant 0 : index
      %49 = vector.load %arg10[%c0_22, %c0_23] : memref<8x1xf32, #tpu.memory_space<vmem>>, vector<8x1xf32>
      tpu.vector_store %arg10[%c0_22, %c0_23], %48 {strides = array<i32>} : memref<8x1xf32, #tpu.memory_space<vmem>>, vector<8x1xf32>,
      %c0_24 = arith.constant 0 : index
      %c0_25 = arith.constant 0 : index
      %50 = vector.load %arg11[%c0_24, %c0_25] : memref<8x64xf32, #tpu.memory_space<vmem>>, vector<8x64xf32>
      %51 = vector.broadcast %38 : vector<8x1xf32> to vector<8x64xf32>
      %52 = arith.mulf %51, %50 : vector<8x64xf32>
      %cst_26 = arith.constant dense<0.000000e+00> : vector<8x64xf32>
      %53 = tpu.matmul %43, %19, %cst_26 {dimension_numbers = #tpu.dot_dimension_numbers<[1], [0], [0], [1], [0, 0, 1, 1], [], []>} : vector<8x512xf32>, vector<512x64xf32>, vector<8x64xf32> -> vector<8x64xf32>
      %54 = arith.addf %52, %53 : vector<8x64xf32>
      %c0_27 = arith.constant 0 : index
      %c0_28 = arith.constant 0 : index
      %55 = vector.load %arg11[%c0_27, %c0_28] : memref<8x64xf32, #tpu.memory_space<vmem>>, vector<8x64xf32>
      tpu.vector_store %arg11[%c0_27, %c0_28], %54 {strides = array<i32>} : memref<8x64xf32, #tpu.memory_space<vmem>>, vector<8x64xf32>,
      %c0_29 = arith.constant 0 : index
      %c0_30 = arith.constant 0 : index
      %56 = vector.load %arg9[%c0_29, %c0_30] : memref<8x1xf32, #tpu.memory_space<vmem>>, vector<8x1xf32>
      tpu.vector_store %arg9[%c0_29, %c0_30], %35 {strides = array<i32>} : memref<8x1xf32, #tpu.memory_space<vmem>>, vector<8x1xf32>,
    } else {
    }
    %c0_i32_2 = arith.constant 0 : i32
    %8 = arith.cmpi eq, %arg1, %c0_i32_2 : i32
    %9 = arith.extui %8 : i1 to i32
    %c0_i32_3 = arith.constant 0 : i32
    %10 = arith.cmpi ne, %9, %c0_i32_3 : i32
    scf.if %10 {
      %c0 = arith.constant 0 : index
      %c0_4 = arith.constant 0 : index
      %11 = vector.load %arg10[%c0, %c0_4] : memref<8x1xf32, #tpu.memory_space<vmem>>, vector<8x1xf32>
      %cst = arith.constant 1.000000e-30 : f32
      %12 = vector.broadcast %cst : f32 to vector<8x1xf32>
      %13 = arith.maximumf %11, %12 : vector<8x1xf32>
      %c0_5 = arith.constant 0 : index
      %c0_6 = arith.constant 0 : index
      %14 = vector.load %arg11[%c0_5, %c0_6] : memref<8x64xf32, #tpu.memory_space<vmem>>, vector<8x64xf32>
      %15 = vector.broadcast %13 : vector<8x1xf32> to vector<8x64xf32>
      %16 = arith.divf %14, %15 : vector<8x64xf32>
      %c0_7 = arith.constant 0 : index
      %c0_8 = arith.constant 0 : index
      %17 = vector.load %arg8[%c0_7, %c0_8] : memref<8x64xf32, #tpu.memory_space<vmem>>, vector<8x64xf32>
      tpu.vector_store %arg8[%c0_7, %c0_8], %16 {strides = array<i32>} : memref<8x64xf32, #tpu.memory_space<vmem>>, vector<8x64xf32>,
    } else {
    }
    return
  }
  func.func @transform_0(%arg0: i32, %arg1: i32, %arg2: memref<1xi32, #tpu.memory_space<smem>>, %arg3: memref<1xi32, #tpu.memory_space<smem>>) -> (i32, i32) {
    %c0_i32 = arith.constant 0 : i32
    %c0_i32_0 = arith.constant 0 : i32
    return %arg0, %c0_i32 : i32, i32
  }
  func.func @transform_1(%arg0: i32, %arg1: i32, %arg2: memref<1xi32, #tpu.memory_space<smem>>, %arg3: memref<1xi32, #tpu.memory_space<smem>>) -> (i32, i32) {
    %c0_i32 = arith.constant 0 : i32
    %c0_i32_0 = arith.constant 0 : i32
    return %arg0, %c0_i32 : i32, i32
  }
  func.func @transform_2(%arg0: i32, %arg1: i32, %arg2: memref<1xi32, #tpu.memory_space<smem>>, %arg3: memref<1xi32, #tpu.memory_space<smem>>) -> (i32, i32) {
    %c0_i32 = arith.constant 0 : i32
    %c0_i32_0 = arith.constant 0 : i32
    return %arg0, %c0_i32 : i32, i32
  }
  func.func @transform_3(%arg0: i32, %arg1: i32, %arg2: memref<1xi32, #tpu.memory_space<smem>>, %arg3: memref<1xi32, #tpu.memory_space<smem>>) -> (i32, i32) {
    %0 = arith.index_cast %arg0 : i32 to index
    %1 = memref.load %arg3[%0] : memref<1xi32, #tpu.memory_space<smem>>
    %c1_i32 = arith.constant 1 : i32
    %2 = arith.subi %1, %c1_i32 : i32
    %c0_i32 = arith.constant 0 : i32
    %3 = arith.maxsi %2, %c0_i32 : i32
    %4 = arith.index_cast %arg0 : i32 to index
    %5 = memref.load %arg2[%4] : memref<1xi32, #tpu.memory_space<smem>>
    %6 = arith.minsi %arg1, %3 : i32
    %7 = arith.addi %5, %6 : i32
    %c0_i32_0 = arith.constant 0 : i32
    %c0_i32_1 = arith.constant 0 : i32
    return %7, %c0_i32_0 : i32, i32
  }
  func.func @transform_4(%arg0: i32, %arg1: i32, %arg2: memref<1xi32, #tpu.memory_space<smem>>, %arg3: memref<1xi32, #tpu.memory_space<smem>>) -> (i32, i32) {
    %c0_i32 = arith.constant 0 : i32
    %c0_i32_0 = arith.constant 0 : i32
    return %arg0, %c0_i32 : i32, i32
  }
}

</mosaic_0001>

<bundles_post_ra>
// kernel: tpu_custom_call.1
= control target key start
LH: loop header
LB: loop body
LE: loop exit
PB: predicated region body
PF: predicated region fallthrough
CT: control target
= control target key end

     0   :  { %s1527_s0 = inlined_call_operand.<no memory space> [shape: s32[1], index: 0, kind: input, shape index: {}]   ;;  %s1528_s1 = inlined_call_operand.<no memory space> [shape: s32[1], index: 1, kind: input, shape index: {}]   ;;  %s1529_s2 = inlined_call_operand.vmem [shape: f32[8,64], index: 2, kind: input, shape index: {}]   ;;  %s1530_s3 = inlined_call_operand.vmem [shape: s32[8,1], index: 3, kind: input, shape index: {}]   ;;  %s1531_s4 = inlined_call_operand.vmem [shape: s32[8,1], index: 4, kind: input, shape index: {}]   ;;  %s1532_s5 = inlined_call_operand.vmem [shape: f32[512,64], index: 5, kind: input, shape index: {}]   ;;  %s1533_s6 = inlined_call_operand.hbm [shape: f32[8,64], index: 6, kind: output, shape index: {}]  }
   0x1   :  { %11 = sst [smem:[#allocation6]] %s1527_s0 }
   0x2   :  { %13 = vsyncpa [#allocation9], 0  ;;  %s760_s25 = sadd.s32 4294967295, %s1528_s1  ;;  %s61_s26 = sld [smem:[#allocation6]]  ;;  %vm83_vm0 = vcmask 7168   ;;  %vm86_vm1 = vcmask 523264  }
   0x3   :  { %p59_p0 = scmp.gt.s32.totalorder %s760_s25, 0  ;;  %v1020_v0 = vmov -inf   ;;  %v1021_v1 = vmov 0.0   ;;  %p765_p2 = scmp.le.s32.totalorder %s1528_s1, 0 }
   0x4   :  { %84 = vst.msk [vmem:[#allocation2] sm:$0xff] %vm83_vm0, %v1020_v0  ;;  %85 = vst.msk [vmem:[#allocation3] sm:$0xff] %vm83_vm0, %v1021_v1 }
   0x5   :  { %87 = vst.msk [vmem:[#allocation4] sm:$0xff] %vm86_vm1, %v1021_v1  ;;  %s1546_s25 = smov (!%p59_p0, %s760_s25), 0 }
   0x6   :  { %s1548_s25 = smov (%p59_p0, %s1546_s25), 0 }
   0x8   :  { %s64_s0 = sadd.s32 %s1548_s25, %s61_s26 }
   0x9   :  { %s762_s27 = sshll.u32 %s64_s0, 6 }
   0xa   :  { %p66_p1 = scmp.lt.s32.totalorder %s762_s27, 63  ;;  %92 = sbr.rel (%p765_p2) target bundleno = 770 (0x302), region = 25 }
   0xc   :  { %s1550_s27 = smov (!%p66_p1, %s762_s27), 63 }
   0xd   :  { %s763_s28 = sshll.u32 %s1550_s27, 3 }
   0xe   :  { %s1072_s7 = scalar_lea.vmem %s1532_s5, %s763_s28 }
   0xf   :  { %v1078_v2 = vld [vmem:[%s1072_s7 + $0xf8] sm:$0xff]  ;;  %v1094_v6 = vld [vmem:[%s1072_s7 + $0xf0] sm:$0xff]  ;;  %v1114_v10 = vld [vmem:[%s1072_s7 + $0xe8] sm:$0xff]  ;;  %v1022_v12 = vmov 0  }
  0x10   :  { %v1081_v3 = vld [vmem:[%s1072_s7 + $0x1f8] sm:$0xff]  ;;  %840 = vmatprep.subr.msk.mxu0 %vm86_vm1, %v1078_v2  ;;  %v1097_v7 = vld [vmem:[%s1072_s7 + $0x1f0] sm:$0xff]  ;;  %v1117_v11 = vld [vmem:[%s1072_s7 + $0x1e8] sm:$0xff]  ;;  %983 = vset.pattern.permute.xlu0 %v1022_v12 }
  0x11   :  { %v1084_v4 = vld [vmem:[%s1072_s7 + $0x78] sm:$0xff]  ;;  %874 = vmatprep.subr.msk.mxu1 %vm86_vm1, %v1081_v3  ;;  %v1108_v8 = vld [vmem:[%s1072_s7 + $0x70] sm:$0xff]  ;;  %984 = vset.pattern.permute.xlu1 %v1022_v12  ;;  %v1128_v13 = vld [vmem:[%s1072_s7 + $0x68] sm:$0xff] }
  0x12   :  { %v1091_v5 = vld [vmem:[%s1072_s7 + $0x178] sm:$0xff]  ;;  %841 = vmatpush3.xpose.msk.msra.mxu0 %vm86_vm1, %v1084_v4  ;;  %v1111_v9 = vld [vmem:[%s1072_s7 + $0x170] sm:$0xff]  ;;  %v1131_v14 = vld [vmem:[%s1072_s7 + $0x168] sm:$0xff] }
  0x13   :  { %875 = vmatpush3.xpose.msk.msra.mxu1 %vm86_vm1, %v1091_v5  ;;  %842 = vmatprep.subr.msk.mxu0 %vm86_vm1, %v1094_v6  ;;  %v1134_v15 = vld [vmem:[%s1072_s7 + $0xe0] sm:$0xff]  ;;  %v1154_v19 = vld [vmem:[%s1072_s7 + $0xd8] sm:$0xff]  ;;  %v1174_v23 = vld [vmem:[%s1072_s7 + $0xd0] sm:$0xff] }
  0x14   :  { %876 = vmatprep.subr.msk.mxu1 %vm86_vm1, %v1097_v7  ;;  %v1137_v16 = vld [vmem:[%s1072_s7 + $0x1e0] sm:$0xff]  ;;  %v1157_v20 = vld [vmem:[%s1072_s7 + $0x1d8] sm:$0xff]  ;;  %v1177_v24 = vld [vmem:[%s1072_s7 + $0x1d0] sm:$0xff] }
  0x15   :  { %v1148_v17 = vld [vmem:[%s1072_s7 + $0x60] sm:$0xff]  ;;  %v1168_v21 = vld [vmem:[%s1072_s7 + $0x58] sm:$0xff]  ;;  %v1188_v25 = vld [vmem:[%s1072_s7 + $0x50] sm:$0xff] }
  0x16   :  { %843 = vmatpush3.xpose.msk.msra.mxu0 %vm86_vm1, %v1108_v8  ;;  %v1151_v18 = vld [vmem:[%s1072_s7 + $0x160] sm:$0xff]  ;;  %v1171_v22 = vld [vmem:[%s1072_s7 + $0x158] sm:$0xff]  ;;  %v1191_v26 = vld [vmem:[%s1072_s7 + $0x150] sm:$0xff] }
  0x17   :  { %877 = vmatpush3.xpose.msk.msra.mxu1 %vm86_vm1, %v1111_v9  ;;  %844 = vmatprep.subr.msk.mxu0 %vm86_vm1, %v1114_v10  ;;  %v1194_v27 = vld [vmem:[%s1072_s7 + $0xc8] sm:$0xff]  ;;  %v1202_v29 = vld [vmem:[%s1529_s2] sm:$0xff]  ;;  %v1249_v39 = vld [vmem:[%s1072_s7 + $0xb8] sm:$0xff]  ;;  %s97_s2 = sld [smem:[#allocation6]] }
  0x18   :  { %878 = vmatprep.subr.msk.mxu1 %vm86_vm1, %v1117_v11  ;;  %v1197_v28 = vld [vmem:[%s1072_s7 + $0x1c8] sm:$0xff]  ;;  %v94_v30 = vld [vmem:[%s1530_s3] sm:$0xff]  ;;  %872 = vmatprep.mubr.msk.f32.mxu0 %vm86_vm1, %v1202_v29  ;;  %v1252_v40 = vld [vmem:[%s1072_s7 + $0x1b8] sm:$0xff] }
  0x19   :  { %v95_v31 = vld [vmem:[%s1531_s4] sm:$0xff]  ;;  %v1219_v32 = vld [vmem:[%s1072_s7 + $0x48] sm:$0xff]  ;;  %906 = vmatprep.mubr.msk.f32.mxu1 %vm86_vm1, %v1202_v29  ;;  %513 = vperm.xlu0 %983, %v94_v30   ;;  %v1263_v41 = vld [vmem:[%s1072_s7 + $0x38] sm:$0xff] }
  0x1a   :  { %845 = vmatpush3.xpose.msk.msra.mxu0 %vm86_vm1, %v1128_v13  ;;  %v1222_v33 = vld [vmem:[%s1072_s7 + $0x148] sm:$0xff]  ;;  %v1225_v34 = vld [vmem:[%s1072_s7 + $0xc0] sm:$0xff]  ;;  %v96_v36 = vadd.s32 %v95_v31, %v94_v30  ;;  %v1266_v42 = vld [vmem:[%s1072_s7 + $0x138] sm:$0xff] }
  0x1b   :  { %879 = vmatpush3.xpose.msk.msra.mxu1 %vm86_vm1, %v1131_v14  ;;  %846 = vmatprep.subr.msk.mxu0 %vm86_vm1, %v1134_v15  ;;  %v1228_v35 = vld [vmem:[%s1072_s7 + $0x1c0] sm:$0xff]  ;;  %v1269_v43 = vld [vmem:[%s1072_s7 + $0xb0] sm:$0xff]  ;;  %v1289_v47 = vld [vmem:[%s1072_s7 + $0xa8] sm:$0xff] }
  0x1c   :  { %880 = vmatprep.subr.msk.mxu1 %vm86_vm1, %v1137_v16  ;;  %v1243_v37 = vld [vmem:[%s1072_s7 + $0x40] sm:$0xff]  ;;  %v1272_v44 = vld [vmem:[%s1072_s7 + $0x1b0] sm:$0xff]  ;;  %v1292_v48 = vld [vmem:[%s1072_s7 + $0x1a8] sm:$0xff] }
  0x1d   :  { %v1246_v38 = vld [vmem:[%s1072_s7 + $0x140] sm:$0xff]  ;;  %520 = vperm.xlu0 %983, %v96_v36   ;;  %v1283_v45 = vld [vmem:[%s1072_s7 + $0x30] sm:$0xff]  ;;  %v1303_v49 = vld [vmem:[%s1072_s7 + $0x28] sm:$0xff]  ;;  %s766_s3 = sshll.u32 %s97_s2, 9 }
  0x1e   :  { %847 = vmatpush3.xpose.msk.msra.mxu0 %vm86_vm1, %v1148_v17  ;;  %v1286_v46 = vld [vmem:[%s1072_s7 + $0x130] sm:$0xff]  ;;  %v1306_v50 = vld [vmem:[%s1072_s7 + $0x128] sm:$0xff]  ;;  %v1309_v51 = vld [vmem:[%s1072_s7 + $0xa0] sm:$0xff] }
  0x1f   :  { %881 = vmatpush3.xpose.msk.msra.mxu1 %vm86_vm1, %v1151_v18  ;;  %848 = vmatprep.subr.msk.mxu0 %vm86_vm1, %v1154_v19  ;;  %v1312_v52 = vld [vmem:[%s1072_s7 + $0x1a0] sm:$0xff]  ;;  %v1329_v55 = vld [vmem:[%s1072_s7 + $0x98] sm:$0xff]  ;;  %v1349_v59 = vld [vmem:[%s1072_s7 + $0x90] sm:$0xff] }
  0x20   :  { %882 = vmatprep.subr.msk.mxu1 %vm86_vm1, %v1157_v20  ;;  %v1323_v53 = vld [vmem:[%s1072_s7 + $0x20] sm:$0xff]  ;;  %v1332_v56 = vld [vmem:[%s1072_s7 + $0x198] sm:$0xff]  ;;  %v1352_v60 = vld [vmem:[%s1072_s7 + $0x190] sm:$0xff] }
  0x21   :  { %v1326_v54 = vld [vmem:[%s1072_s7 + $0x120] sm:$0xff]  ;;  %v1343_v57 = vld [vmem:[%s1072_s7 + $0x18] sm:$0xff]  ;;  %v1363_v61 = vld [vmem:[%s1072_s7 + $0x10] sm:$0xff] }
  0x22   :  { %849 = vmatpush3.xpose.msk.msra.mxu0 %vm86_vm1, %v1168_v21  ;;  %v1346_v58 = vld [vmem:[%s1072_s7 + $0x118] sm:$0xff]  ;;  %v1366_v62 = vld [vmem:[%s1072_s7 + $0x110] sm:$0xff]  ;;  %v1369_v63 = vld [vmem:[%s1072_s7 + $0x88] sm:$0xff] }
  0x23   :  { %883 = vmatpush3.xpose.msk.msra.mxu1 %vm86_vm1, %v1171_v22  ;;  %850 = vmatprep.subr.msk.mxu0 %vm86_vm1, %v1174_v23  ;;  %v1372_v0 = vld [vmem:[%s1072_s7 + $0x188] sm:$0xff]  ;;  %v1389_v30 = vld [vmem:[%s1072_s7 + $0x80] sm:$0xff] }
  0x24   :  { %884 = vmatprep.subr.msk.mxu1 %vm86_vm1, %v1177_v24  ;;  %1535 = vst [vmem:[#allocation11_spill] sm:$0xff] %v1372_v0  ;;  %v1383_v1 = vld [vmem:[%s1072_s7 + $0x8] sm:$0xff]  ;;  %v1392_v31 = vld [vmem:[%s1072_s7 + $0x180] sm:$0xff] }
  0x25   :  { %v1386_v12 = vld [vmem:[%s1072_s7 + $0x108] sm:$0xff]  ;;  %v1403_v36 = vld [vmem:[%s1072_s7] sm:$0xff] }
  0x26   :  { %851 = vmatpush3.xpose.msk.msra.mxu0 %vm86_vm1, %v1188_v25 }
  0x27   :  { %885 = vmatpush3.xpose.msk.msra.mxu1 %vm86_vm1, %v1191_v26  ;;  %852 = vmatprep.subr.msk.mxu0 %vm86_vm1, %v1194_v27 }
  0x28   :  { %886 = vmatprep.subr.msk.mxu1 %vm86_vm1, %v1197_v28 }
  0x2a   :  { %853 = vmatpush3.xpose.msk.msra.mxu0 %vm86_vm1, %v1219_v32 }
  0x2b   :  { %887 = vmatpush3.xpose.msk.msra.mxu1 %vm86_vm1, %v1222_v33  ;;  %854 = vmatprep.subr.msk.mxu0 %vm86_vm1, %v1225_v34 }
  0x2c   :  { %888 = vmatprep.subr.msk.mxu1 %vm86_vm1, %v1228_v35 }
  0x2e   :  { %855 = vmatpush3.xpose.msk.msra.mxu0 %vm86_vm1, %v1243_v37 }
  0x2f   :  { %889 = vmatpush3.xpose.msk.msra.mxu1 %vm86_vm1, %v1246_v38  ;;  %856 = vmatprep.subr.msk.mxu0 %vm86_vm1, %v1249_v39 }
  0x30   :  { %890 = vmatprep.subr.msk.mxu1 %vm86_vm1, %v1252_v40 }
  0x32   :  { %857 = vmatpush3.xpose.msk.msra.mxu0 %vm86_vm1, %v1263_v41 }
  0x33   :  { %891 = vmatpush3.xpose.msk.msra.mxu1 %vm86_vm1, %v1266_v42  ;;  %858 = vmatprep.subr.msk.mxu0 %vm86_vm1, %v1269_v43 }
  0x34   :  { %892 = vmatprep.subr.msk.mxu1 %vm86_vm1, %v1272_v44 }
  0x36   :  { %859 = vmatpush3.xpose.msk.msra.mxu0 %vm86_vm1, %v1283_v45 }
  0x37   :  { %893 = vmatpush3.xpose.msk.msra.mxu1 %vm86_vm1, %v1286_v46  ;;  %860 = vmatprep.subr.msk.mxu0 %vm86_vm1, %v1289_v47 }
  0x38   :  { %894 = vmatprep.subr.msk.mxu1 %vm86_vm1, %v1292_v48 }
  0x3a   :  { %861 = vmatpush3.xpose.msk.msra.mxu0 %vm86_vm1, %v1303_v49 }
  0x3b   :  { %895 = vmatpush3.xpose.msk.msra.mxu1 %vm86_vm1, %v1306_v50  ;;  %862 = vmatprep.subr.msk.mxu0 %vm86_vm1, %v1309_v51 }
  0x3c   :  { %896 = vmatprep.subr.msk.mxu1 %vm86_vm1, %v1312_v52 }
  0x3e   :  { %863 = vmatpush3.xpose.msk.msra.mxu0 %vm86_vm1, %v1323_v53 }
  0x3f   :  { %897 = vmatpush3.xpose.msk.msra.mxu1 %vm86_vm1, %v1326_v54  ;;  %864 = vmatprep.subr.msk.mxu0 %vm86_vm1, %v1329_v55 }
  0x40   :  { %898 = vmatprep.subr.msk.mxu1 %vm86_vm1, %v1332_v56 }
  0x42   :  { %865 = vmatpush3.xpose.msk.msra.mxu0 %vm86_vm1, %v1343_v57 }
  0x43   :  { %899 = vmatpush3.xpose.msk.msra.mxu1 %vm86_vm1, %v1346_v58  ;;  %866 = vmatprep.subr.msk.mxu0 %vm86_vm1, %v1349_v59 }
  0x44   :  { %900 = vmatprep.subr.msk.mxu1 %vm86_vm1, %v1352_v60 }
  0x46   :  { %867 = vmatpush3.xpose.msk.msra.mxu0 %vm86_vm1, %v1363_v61 }
  0x47   :  { %901 = vmatpush3.xpose.msk.msra.mxu1 %vm86_vm1, %v1366_v62  ;;  %868 = vmatprep.subr.msk.mxu0 %vm86_vm1, %v1369_v63 }
  0x48   :  { %902 = vmatprep.subr.msk.mxu1 %vm86_vm1, %v1372_v0  ;;  %v1406_v0 = vld [vmem:[%s1072_s7 + $0x100] sm:$0xff] }
  0x4a   :  { %869 = vmatpush3.xpose.msk.msra.mxu0 %vm86_vm1, %v1383_v1 }
  0x4b   :  { %903 = vmatpush3.xpose.msk.msra.mxu1 %vm86_vm1, %v1386_v12  ;;  %870 = vmatprep.subr.msk.mxu0 %vm86_vm1, %v1389_v30 }
  0x4c   :  { %904 = vmatprep.subr.msk.mxu1 %vm86_vm1, %v1392_v31 }
  0x4e   :  { %871 = vmatpush3.xpose.msk.msra.mxu0 %vm86_vm1, %v1403_v36 }
  0x4f   :  { %905 = vmatpush3.xpose.msk.msra.mxu1 %vm86_vm1, %v1406_v0  ;;  %908 = vmatprep.subr.mxu0 %v1078_v2  ;;  %v1536_v2 = vld [vmem:[#allocation11_spill] sm:$0xff] }
  0x50   :  { %943 = vmatprep.subr.mxu1 %v1081_v3  ;;  %v502_v3 = vlaneseq }
  0x51   :  { %873 = vmatmul.mubr.msk.f32.vlgmr.msra.gmra.mxu0 %vm86_vm1, %v1202_v29 }
  0x52   :  { %907 = vmatmul.mubr.msk.f32.vlgmr.msra.gmra.mxu1 %vm86_vm1, %v1202_v29  ;;  %909 = vmatpush3.msra.mxu0 %v1084_v4  ;;  %v503_v4 = vand.u32 127, %v502_v3 }
  0x53   :  { %944 = vmatpush3.msra.mxu1 %v1091_v5  ;;  %910 = vmatprep.subr.mxu0 %v1094_v6  ;;  %v507_v6 = vstv %s766_s3 }
  0x54   :  { %945 = vmatprep.subr.mxu1 %v1097_v7  ;;  %911 = vmatpush3.msra.mxu0 %v1108_v8  ;;  %v505_v7 = vadd.s32 256, %v503_v4  ;;  %v504_v8 = vadd.s32 128, %v503_v4 }
  0x55   :  { %946 = vmatpush3.msra.mxu1 %v1111_v9  ;;  %912 = vmatprep.subr.mxu0 %v1114_v10  ;;  %v506_v9 = vadd.s32 384, %v503_v4  ;;  %v508_v10 = vadd.s32 %v507_v6, %v503_v4 }
  0x56   :  { %947 = vmatprep.subr.mxu1 %v1117_v11  ;;  %913 = vmatpush3.msra.mxu0 %v1128_v13  ;;  %v510_v13 = vadd.s32 %v507_v6, %v505_v7 }
  0x57   :  { %948 = vmatpush3.msra.mxu1 %v1131_v14  ;;  %914 = vmatprep.subr.mxu0 %v1134_v15  ;;  %v509_v14 = vadd.s32 %v507_v6, %v504_v8  ;;  %v511_v15 = vadd.s32 %v507_v6, %v506_v9 }
  0x58   :  { %949 = vmatprep.subr.mxu1 %v1137_v16  ;;  %915 = vmatpush3.msra.mxu0 %v1148_v17 }
  0x59   :  { %950 = vmatpush3.msra.mxu1 %v1151_v18  ;;  %916 = vmatprep.subr.mxu0 %v1154_v19 }
  0x5a   :  { %951 = vmatprep.subr.mxu1 %v1157_v20  ;;  %917 = vmatpush3.msra.mxu0 %v1168_v21 }
  0x5b   :  { %952 = vmatpush3.msra.mxu1 %v1171_v22  ;;  %918 = vmatprep.subr.mxu0 %v1174_v23 }
  0x5c   :  { %953 = vmatprep.subr.mxu1 %v1177_v24  ;;  %919 = vmatpush3.msra.mxu0 %v1188_v25 }
  0x5d   :  { %954 = vmatpush3.msra.mxu1 %v1191_v26  ;;  %920 = vmatprep.subr.mxu0 %v1194_v27 }
  0x5e   :  { %955 = vmatprep.subr.mxu1 %v1197_v28  ;;  %921 = vmatpush3.msra.mxu0 %v1219_v32 }
  0x5f   :  { %956 = vmatpush3.msra.mxu1 %v1222_v33  ;;  %922 = vmatprep.subr.mxu0 %v1225_v34  ;;  %v534_v33 = vld [vmem:[#allocation2] sm:$0xff] }
  0x60   :  { %957 = vmatprep.subr.mxu1 %v1228_v35  ;;  %923 = vmatpush3.msra.mxu0 %v1243_v37 }
  0x61   :  { %958 = vmatpush3.msra.mxu1 %v1246_v38  ;;  %924 = vmatprep.subr.mxu0 %v1249_v39 }
  0x62   :  { %959 = vmatprep.subr.mxu1 %v1252_v40  ;;  %925 = vmatpush3.msra.mxu0 %v1263_v41 }
  0x63   :  { %960 = vmatpush3.msra.mxu1 %v1266_v42  ;;  %926 = vmatprep.subr.mxu0 %v1269_v43 }
  0x64   :  { %961 = vmatprep.subr.mxu1 %v1272_v44  ;;  %927 = vmatpush3.msra.mxu0 %v1283_v45 }
  0x65   :  { %962 = vmatpush3.msra.mxu1 %v1286_v46  ;;  %928 = vmatprep.subr.mxu0 %v1289_v47 }
  0x66   :  { %963 = vmatprep.subr.mxu1 %v1292_v48  ;;  %929 = vmatpush3.msra.mxu0 %v1303_v49 }
  0x67   :  { %964 = vmatpush3.msra.mxu1 %v1306_v50  ;;  %930 = vmatprep.subr.mxu0 %v1309_v51 }
  0x68   :  { %965 = vmatprep.subr.mxu1 %v1312_v52  ;;  %931 = vmatpush3.msra.mxu0 %v1323_v53 }
  0x69   :  { %966 = vmatpush3.msra.mxu1 %v1326_v54  ;;  %932 = vmatprep.subr.mxu0 %v1329_v55 }
  0x6a   :  { %967 = vmatprep.subr.mxu1 %v1332_v56  ;;  %933 = vmatpush3.msra.mxu0 %v1343_v57 }
  0x6b   :  { %968 = vmatpush3.msra.mxu1 %v1346_v58  ;;  %934 = vmatprep.subr.mxu0 %v1349_v59 }
  0x6c   :  { %969 = vmatprep.subr.mxu1 %v1352_v60  ;;  %935 = vmatpush3.msra.mxu0 %v1363_v61  ;;  %v565_v60 = vld [vmem:[#allocation3] sm:$0xff] }
  0x6d   :  { %970 = vmatpush3.msra.mxu1 %v1366_v62  ;;  %936 = vmatprep.subr.mxu0 %v1369_v63 }
  0x6e   :  { %971 = vmatprep.subr.mxu1 %v1536_v2  ;;  %937 = vmatpush3.msra.mxu0 %v1383_v1 }
  0x6f   :  { %972 = vmatpush3.msra.mxu1 %v1386_v12  ;;  %938 = vmatprep.subr.mxu0 %v1389_v30 }
  0x70   :  { %973 = vmatprep.subr.mxu1 %v1392_v31  ;;  %939 = vmatpush3.msra.mxu0 %v1403_v36  ;;  %v575_v31 = vld [vmem:[#allocation4] sm:$0xff] }
  0x71   :  { %974 = vmatpush3.msra.mxu1 %v1406_v0 }
  0x94   :  { %v514_v5 = vpop.permute.xlu0 %513 }
  0x95   :  { %vm515_vm2 = vcmp.ge.s32.totalorder %v508_v10, %v514_v5  ;;  %vm517_vm4 = vcmp.ge.s32.totalorder %v510_v13, %v514_v5  ;;  %vm516_vm6 = vcmp.ge.s32.totalorder %v509_v14, %v514_v5  ;;  %vm518_vm9 = vcmp.ge.s32.totalorder %v511_v15, %v514_v5 }
  0x98   :  { %v521_v11 = vpop.permute.xlu0 %520 }
  0x99   :  { %vm522_vm3 = vcmp.lt.s32.totalorder %v508_v10, %v521_v11  ;;  %vm524_vm5 = vcmp.lt.s32.totalorder %v510_v13, %v521_v11  ;;  %vm523_vm7 = vcmp.lt.s32.totalorder %v509_v14, %v521_v11  ;;  %vm525_vm10 = vcmp.lt.s32.totalorder %v511_v15, %v521_v11 }
  0x9a   :  { %vm1480_vm8 = vmand %vm515_vm2, %vm522_vm3 }
  0x9b   :  { %vm1484_vm11 = vmand %vm517_vm4, %vm524_vm5 }
  0x9c   :  { %vm1488_vm12 = vmand %vm516_vm6, %vm523_vm7 }
  0x9d   :  { %vm1494_vm13 = vmand %vm518_vm9, %vm525_vm10 }
 0x111   :  { %v426_v17 = vpop.f32.mrf.mxu0 }
 0x112   :  { %v497_v18 = vpop.f32.mrf.mxu1  ;;  %v530_v21 = vsel %vm1480_vm8, %v426_v17, -1e+30 }
 0x113   :  { %v428_v22 = vpop.f32.mrf.mxu0  ;;  %v532_v25 = vsel %vm1484_vm11, %v497_v18, -1e+30 }
 0x114   :  { %v499_v23 = vpop.f32.mrf.mxu1  ;;  %v531_v26 = vsel %vm1488_vm12, %v428_v22, -1e+30 }
 0x115   :  { %v533_v27 = vsel %vm1494_vm13, %v499_v23, -1e+30  ;;  %v535_v28 = vmax.f32 %v530_v21, %v531_v26 }
 0x116   :  { %v536_v29 = vmax.f32 %v532_v25, %v533_v27 }
 0x118   :  { %v537_v32 = vmax.f32 %v535_v28, %v536_v29 }
 0x11a   :  { %538 = vmax.xlane.f32.xlu1 %v537_v32 }
 0x1a3   :  { %v539_v34 = vpop.xlane.xlu1 %538 }
 0x1a4   :  { %v540_v35 = vmax.f32 %v534_v33, %v539_v34 }
 0x1a6   :  { %v541_v37 = vsub.f32 %v534_v33, %v540_v35  ;;  %724 = vst.msk [vmem:[#allocation2] sm:$0xff] %vm83_vm0, %v540_v35  ;;  %546 = vperm.xlu1 %984, %v540_v35  }
 0x1a8   :  { %v542_v38 = vmul.f32 1.442695, %v541_v37 }
 0x1aa   :  { %985 = vpow2.f32 %v542_v38 }
 0x1b7   :  { %v986_v39 = vpop.eup %985 }
 0x1b8   :  { %578 = vperm.xlu1 %984, %v986_v39   ;;  %v566_v61 = vmul.f32 %v986_v39, %v565_v60 }
 0x221   :  { %v547_v40 = vpop.permute.xlu1 %546 }
 0x222   :  { %v549_v41 = vsub.f32 %v426_v17, %v547_v40  ;;  %v550_v42 = vsub.f32 %v428_v22, %v547_v40  ;;  %v551_v43 = vsub.f32 %v497_v18, %v547_v40  ;;  %v552_v44 = vsub.f32 %v499_v23, %v547_v40 }
 0x224   :  { %v553_v45 = vmul.f32 1.442695, %v549_v41  ;;  %v555_v46 = vmul.f32 1.442695, %v550_v42  ;;  %v557_v47 = vmul.f32 1.442695, %v551_v43 }
 0x225   :  { %v559_v48 = vmul.f32 1.442695, %v552_v44 }
 0x226   :  { %987 = vpow2.f32 %v553_v45 }
 0x227   :  { %989 = vpow2.f32 %v555_v46 }
 0x228   :  { %991 = vpow2.f32 %v557_v47 }
 0x229   :  { %993 = vpow2.f32 %v559_v48 }
 0x233   :  { %v988_v49 = vpop.eup %987  ;;  %v579_v36 = vpop.permute.xlu1 %578 }
 0x234   :  { %v990_v50 = vpop.eup %989  ;;  %v561_v51 = vsel %vm1480_vm8, %v988_v49, 0.0  ;;  %v581_v4 = vmul.f32 %v579_v36, %v575_v31 }
 0x235   :  { %v992_v52 = vpop.eup %991  ;;  %833 = vmatprep.mubr.msk.f32.mxu0 %vm1488_vm12, %v990_v50  ;;  %v562_v53 = vsel %vm1488_vm12, %v990_v50, 0.0 }
 0x236   :  { %v994_v54 = vpop.eup %993  ;;  %834 = vmatmul.mubr.msk.f32.vlgmr.msra.gmra.mxu0 %vm1480_vm8, %v988_v49  ;;  %v567_v55 = vadd.f32 %v562_v53, %v561_v51  ;;  %v563_v56 = vsel %vm1484_vm11, %v992_v52, 0.0 }
 0x237   :  { %835 = vmatprep.mubr.msk.f32.mxu1 %vm1494_vm13, %v994_v54  ;;  %v564_v58 = vsel %vm1494_vm13, %v994_v54, 0.0 }
 0x238   :  { %836 = vmatmul.mubr.msk.f32.vlgmr.msra.gmra.mxu1 %vm1484_vm11, %v992_v52  ;;  %v568_v57 = vadd.f32 %v567_v55, %v563_v56 }
 0x23a   :  { %v569_v59 = vadd.f32 %v568_v57, %v564_v58 }
 0x23c   :  { %570 = vadd.xlane.f32.xlu0 %v569_v59 }
 0x2c5   :  { %v571_v62 = vpop.xlane.xlu0 %570 }
 0x2c6   :  { %v572_v63 = vadd.f32 %v571_v62, %v566_v61 }
 0x2c8   :  { %574 = vst.msk [vmem:[#allocation3] sm:$0xff] %vm83_vm0, %v572_v63 }
 0x2f6   :  { %v940_v0 = vpop.f32.mrf.mxu0 }
 0x2f8   :  { %v975_v1 = vpop.f32.mrf.mxu1  ;;  %v941_v12 = vpop.f32.mrf.mxu0 }
 0x2f9   :  { %v942_v30 = vadd.f32 %v941_v12, %v940_v0 }
 0x2fa   :  { %v976_v2 = vpop.f32.mrf.mxu1 }
 0x2fb   :  { %v977_v3 = vadd.f32 %v976_v2, %v975_v1 }
 0x2fd   :  { %v719_v5 = vadd.f32 %v977_v3, %v942_v30 }
 0x2ff   :  { %v722_v6 = vadd.f32 %v719_v5, %v581_v4 }
 0x301   :  { %723 = vst.msk [vmem:[#allocation4] sm:$0xff] %vm86_vm1, %v722_v6 }
 0x302 PF:  { %v728_v7 = vld [vmem:[#allocation3] sm:$0xff]  ;;  %v1023_v8 = vmov 0   ;;  %s1024_s4 = smov [#allocation8]  }
 0x303   :  { %995 = vset.pattern.permute.xlu0 %v1023_v8  ;;  %v729_v9 = vmax.f32 %v728_v7, 1e-30  ;;  %s746_s14 = sshll.u32 %s1024_s4, 4  ;;  %s747_s14 = int_to_ptr.vmem [resolvable:$true] %s746_s14 }
 0x304   :  { %s998_s15 = scalar_lea.vmem %s747_s14, 128  ;;  %p1003_p4 = scmp.lt.s32.totalorder %s747_s14, %s747_s14 }
 0x305   :  { %733 = vperm.xlu0 %995, %v729_v9   ;;  %p999_p3 = scmp.ne.s32.totalorder %s747_s14, %s998_s15  ;;  %p1004_p5 = scmp.lt.s32.totalorder %s998_s15, %s998_s15 }
 0x307   :  { %p1005_p6 = por %p1004_p5, %p1003_p4 }
 0x308   :  { %v730_v11 = vld [vmem:[#allocation4] sm:$0xff] }
 0x309   :  { %p1006_p7 = pnand %p1005_p6, %p999_p3 }
 0x380   :  { %v734_v10 = vpop.permute.xlu0 %733 }
 0x381   :  { %996 = vrcp.f32 %v734_v10 }
 0x38e   :  { %v997_v13 = vpop.eup %996 }
 0x38f   :  { %v737_v14 = vmul.f32 %v997_v13, %v730_v11 }
 0x391   :  { %739 = vst.msk [vmem:[#allocation8] sm:$0xff] %vm86_vm1, %v737_v14 }
 0x392   :  { %1009 = shalt.err (!%p1006_p7)
}
 0x393   :  { %749 = dma.vmem_to_hbm [thread:$0]  %s747_s14, 128, %s1533_s6, [#allocation9]  }
 0x394   :  { %1018 = dma.done.wait [#allocation9], 128  }
 0x395   :  { %1019 = vsyncadd [#allocation9], 4294967168 }
 0x396   :  { %753 = vsyncpa [#allocation9], 1 }

</bundles_post_ra>
